<compile_context>
chip_gen: v5e
topology: v5e:2x2
jax: 0.10.0
libtpu: 0.0.40
codegen_flags: <defaults>
</compile_context>

<pallas_src>
import jax
import jax.numpy as jnp
from jax.experimental import pallas as pl
from jax.experimental.pallas import tpu as pltpu


# ----------------------------- Pallas kernel --------------------------------
def koopman_fused_kernel(x_ref, u_ref, at_ref, bt_ref, o_ref):
    # out = x @ A^T + u @ B^T, accumulated in f32 on the MXU.
    acc = jnp.dot(x_ref[...], at_ref[...], preferred_element_type=jnp.float32)
    acc = acc + jnp.dot(u_ref[...], bt_ref[...], preferred_element_type=jnp.float32)
    o_ref[...] = acc.astype(o_ref.dtype)


# ----------------------------- wrappers --------------------------------------
def prepare_params(lA_weight, lB_weight):
    """One-time weight prep (do this at init / param storage time).

    lA_weight: (Nk, Nk)    PyTorch nn.Linear layout (out x in)
    lB_weight: (Nk, u_dim)
    returns:   (A^T, B^T)  with shapes (Nk, Nk) and (u_dim, Nk)
    """
    return lA_weight.T, lB_weight.T


def koopman_forward(x, u, at, bt, *, block_m=512):
    """Network.forward: lA(x) + lB(u)  ==  x @ A^T + u @ B^T.

    x:  (B, Nk)     f32
    u:  (B, u_dim)  f32
    at: (Nk, Nk)    f32   (= lA.weight.T)
    bt: (u_dim, Nk) f32   (= lB.weight.T)
    """
    B = x.shape[0]
    Nk = at.shape[1]

    if B <= block_m:
        # Small batch: single shot, no grid, everything resident in VMEM.
        return pl.pallas_call(
            koopman_fused_kernel,
            out_shape=jax.ShapeDtypeStruct((B, Nk), x.dtype),
            in_specs=[
                pl.BlockSpec(memory_space=pltpu.MemorySpace.VMEM),
                pl.BlockSpec(memory_space=pltpu.MemorySpace.VMEM),
                pl.BlockSpec(memory_space=pltpu.MemorySpace.VMEM),
                pl.BlockSpec(memory_space=pltpu.MemorySpace.VMEM),
            ],
            out_specs=pl.BlockSpec(memory_space=pltpu.MemorySpace.VMEM),
        )(x, u, at, bt)

    # Large batch: tile over rows; the weight blocks are identical at every
    # grid step (stay resident in VMEM); "parallel" allows megacore sharding.
    grid_m = pl.cdiv(B, block_m)
    padded = grid_m * block_m
    if padded != B:
        x = jnp.pad(x, ((0, padded - B), (0, 0)))
        u = jnp.pad(u, ((0, padded - B), (0, 0)))

    out = pl.pallas_call(
        koopman_fused_kernel,
        out_shape=jax.ShapeDtypeStruct((padded, Nk), x.dtype),
        grid=(grid_m,),
        in_specs=[
            pl.BlockSpec((block_m, x.shape[1]), lambda i: (i, 0)),
            pl.BlockSpec((block_m, u.shape[1]), lambda i: (i, 0)),
            pl.BlockSpec(at.shape, lambda i: (0, 0)),
            pl.BlockSpec(bt.shape, lambda i: (0, 0)),
        ],
        out_specs=pl.BlockSpec((block_m, Nk), lambda i: (i, 0)),
        compiler_params=pltpu.CompilerParams(
            dimension_semantics=("parallel",)
        ),
    )(x, u, at, bt)
    return out[:B] if padded != B else out


# ------------------------- parameter initialization --------------------------
def init_params(key, Nkoopman, u_dim):
    """Re-implementation of Network.__init__ weight setup for lA / lB."""
    k_a, k_b = jax.random.split(key, 2)

    # gaussian_init_(Nkoopman, std=1): Normal(0, 1/Nkoopman), shape (Nk, Nk).
    A0 = jax.random.normal(k_a, (Nkoopman, Nkoopman), dtype=jnp.float32) / Nkoopman
    # Orthogonalize via SVD and scale by 0.9 (as in the module).
    U, _, Vt = jnp.linalg.svd(A0, full_matrices=False)
    lA_weight = (U @ Vt) * 0.9  # (Nk, Nk)

    # lB: default nn.Linear(u_dim, Nkoopman) init -> U(-1/sqrt(u_dim), 1/sqrt(u_dim))
    bound = 1.0 / jnp.sqrt(jnp.float32(u_dim))
    lB_weight = jax.random.uniform(
        k_b, (Nkoopman, u_dim), minval=-bound, maxval=bound, dtype=jnp.float32
    )
    return lA_weight, lB_weight


# ---------------------------------- main -------------------------------------
if __name__ == "__main__":
    key = jax.random.PRNGKey(0)
    k_params, k_x, k_u, k_x2, k_u2 = jax.random.split(key, 5)

    Nkoopman = 32
    u_dim = 4

    lA_weight, lB_weight = init_params(k_params, Nkoopman, u_dim)
    at, bt = prepare_params(lA_weight, lB_weight)  # one-time weight prep

    # --- small batch (no-grid path) ---
    batch = 8
    x = jax.random.normal(k_x, (batch, Nkoopman), dtype=jnp.float32)
    u = jax.random.normal(k_u, (batch, u_dim), dtype=jnp.float32)
    out = jax.block_until_ready(koopman_forward(x, u, at, bt))
    ref = x @ lA_weight.T + u @ lB_weight.T
    assert out.shape == (batch, Nkoopman)
    assert jnp.allclose(out, ref, atol=1e-5, rtol=1e-5)

    # --- larger batch (tiled grid path, exercises padding + resident weights) ---
    batch2 = 600
    x2 = jax.random.normal(k_x2, (batch2, Nkoopman), dtype=jnp.float32)
    u2 = jax.random.normal(k_u2, (batch2, u_dim), dtype=jnp.float32)
    out2 = jax.block_until_ready(koopman_forward(x2, u2, at, bt))
    ref2 = x2 @ lA_weight.T + u2 @ lB_weight.T
    assert out2.shape == (batch2, Nkoopman)
    assert jnp.allclose(out2, ref2, atol=1e-5, rtol=1e-5)

    print("KERNEL_OK")
</pallas_src>

<mosaic_0001>
module attributes {stable_mosaic.version = 11 : i64} {
  func.func @koopman_fused_kernel(%arg0: memref<8x32xf32, #tpu.memory_space<vmem>>, %arg1: memref<8x4xf32, #tpu.memory_space<vmem>>, %arg2: memref<32x32xf32, #tpu.memory_space<vmem>>, %arg3: memref<4x32xf32, #tpu.memory_space<vmem>>, %arg4: memref<8x32xf32, #tpu.memory_space<vmem>>) attributes {dimension_semantics = [], scalar_prefetch = 0 : i64, scratch_operands = 0 : i64, tpu.core_type = #tpu.core_type<tc>} {
    %c0 = arith.constant 0 : index
    %c0_0 = arith.constant 0 : index
    %0 = vector.load %arg0[%c0, %c0_0] : memref<8x32xf32, #tpu.memory_space<vmem>>, vector<8x32xf32>
    %c0_1 = arith.constant 0 : index
    %c0_2 = arith.constant 0 : index
    %1 = vector.load %arg2[%c0_1, %c0_2] : memref<32x32xf32, #tpu.memory_space<vmem>>, vector<32x32xf32>
    %cst = arith.constant dense<0.000000e+00> : vector<8x32xf32>
    %2 = tpu.matmul %0, %1, %cst {dimension_numbers = #tpu.dot_dimension_numbers<[1], [0], [0], [1], [0, 0, 1, 1], [], []>} : vector<8x32xf32>, vector<32x32xf32>, vector<8x32xf32> -> vector<8x32xf32>
    %c0_3 = arith.constant 0 : index
    %c0_4 = arith.constant 0 : index
    %3 = vector.load %arg1[%c0_3, %c0_4] : memref<8x4xf32, #tpu.memory_space<vmem>>, vector<8x4xf32>
    %c0_5 = arith.constant 0 : index
    %c0_6 = arith.constant 0 : index
    %4 = vector.load %arg3[%c0_5, %c0_6] : memref<4x32xf32, #tpu.memory_space<vmem>>, vector<4x32xf32>
    %cst_7 = arith.constant dense<0.000000e+00> : vector<8x32xf32>
    %5 = tpu.matmul %3, %4, %cst_7 {dimension_numbers = #tpu.dot_dimension_numbers<[1], [0], [0], [1], [0, 0, 1, 1], [], []>} : vector<8x4xf32>, vector<4x32xf32>, vector<8x32xf32> -> vector<8x32xf32>
    %6 = arith.addf %2, %5 : vector<8x32xf32>
    %c0_8 = arith.constant 0 : index
    %c0_9 = arith.constant 0 : index
    %7 = vector.load %arg4[%c0_8, %c0_9] : memref<8x32xf32, #tpu.memory_space<vmem>>, vector<8x32xf32>
    tpu.vector_store %arg4[%c0_8, %c0_9], %6 {strides = array<i32>} : memref<8x32xf32, #tpu.memory_space<vmem>>, vector<8x32xf32>,
    return
  }
}

</mosaic_0001>

<bundles_post_ra>
// kernel: tpu_custom_call.1
= control target key start
LH: loop header
LB: loop body
LE: loop exit
PB: predicated region body
PF: predicated region fallthrough
CT: control target
= control target key end

     0   :  { %9 = vsyncpa [#allocation3], 0  ;;  %s214_s0 = inlined_call_operand.vmem [shape: f32[8,32], index: 0, kind: input, shape index: {}]   ;;  %s215_s1 = inlined_call_operand.vmem [shape: f32[8,4], index: 1, kind: input, shape index: {}]   ;;  %s216_s2 = inlined_call_operand.hbm [shape: f32[32,32], index: 2, kind: input, shape index: {}]   ;;  %s217_s3 = inlined_call_operand.vmem [shape: f32[4,32], index: 3, kind: input, shape index: {}]   ;;  %s218_s4 = inlined_call_operand.hbm [shape: f32[8,32], index: 4, kind: output, shape index: {}]  }
   0x1   :  { %10 = vsyncpa [#allocation4], 0  ;;  %s19_s17 = sshll.u32 %s216_s2, 4  ;;  %s170_s18 = smov [#allocation2]   ;;  %s20_s17 = int_to_ptr.hbm [resolvable:$true] %s19_s17 }
   0x2   :  { %s21_s19 = sshll.u32 %s170_s18, 4  ;;  %s171_s20 = smov 128   ;;  %s22_s19 = int_to_ptr.vmem [resolvable:$true] %s21_s19 }
   0x3   :  { %s172_s21 = smov 8  }
   0x4   :  { %27 = dma.hbm_to_vmem [thread:$0]  %s20_s17, 512, %s22_s19, [#allocation3], %s171_s20, %s171_s20, %s172_s21  }
   0x5   :  { %166 = dma.done.wait [#allocation3], 512  }
   0x6   :  { %167 = vsyncadd [#allocation3], 4294966784  ;;  %vm45_vm0 = vcmask 1043456   ;;  %v38_v0 = vld [vmem:[#allocation2 + $0x18] sm:$0xff]  ;;  %v37_v1 = vld [vmem:[#allocation2 + $0x10] sm:$0xff]  ;;  %vm41_vm1 = vcmask 31744  }
   0x7   :  { %85 = vmatpush.msra.mxu1 %v38_v0  ;;  %v40_v2 = vld [vmem:[%s217_s3] sm:$0xf]  ;;  %v36_v4 = vld [vmem:[#allocation2 + $0x8] sm:$0xff]  ;;  %vm69_vm2 = vcmask 261120   ;;  %s173_s27 = smov [#allocation5]  }
   0x8   :  { %v39_v3 = vld [vmem:[%s215_s1] sm:$0xff]  ;;  %111 = vmatpush.msk.msra.mxu0 %vm45_vm0, %v40_v2  ;;  %s99_s3 = sshll.u32 %s173_s27, 4  ;;  %s101_s1 = sshll.u32 %s218_s4, 4  ;;  %s100_s3 = int_to_ptr.vmem [resolvable:$true] %s99_s3  ;;  %s102_s1 = int_to_ptr.hbm [resolvable:$true] %s101_s1 }
   0x9   :  { %86 = vmatpush.msra.mxu1 %v37_v1  ;;  %112 = vmatmul.msk.f32.vlgmr.msra.gmra.mxu0 %vm41_vm1, %v39_v3  ;;  %v35_v5 = vld [vmem:[#allocation2] sm:$0xff] }
   0xa   :  { %v34_v6 = vld [vmem:[%s214_s0] sm:$0xff] }
   0xb   :  { %87 = vmatpush.msra.mxu1 %v36_v4 }
   0xd   :  { %88 = vmatpush.msra.mxu1 %v35_v5 }
   0xe   :  { %113 = vmatmul.msk.f32.vlgmr.msra.gmra.mxu1 %vm69_vm2, %v34_v6 }
  0x86   :  { %v66_v7 = vpop.f32.mrf.mxu0 }
  0x8b   :  { %v90_v8 = vpop.f32.mrf.mxu1 }
  0x8c   :  { %v91_v9 = vadd.f32 %v90_v8, %v66_v7 }
  0x8e   :  { %93 = vst.msk [vmem:[#allocation5] sm:$0xff] %vm69_vm2, %v91_v9 }
  0x8f   :  { %104 = dma.vmem_to_hbm [thread:$0]  %s100_s3, 128, %s102_s1, [#allocation4]  }
  0x90   :  { %168 = dma.done.wait [#allocation4], 128  }
  0x91   :  { %169 = vsyncadd [#allocation4], 4294967168 }
  0x92   :  { %109 = vsyncpa [#allocation3], 1 }
  0x93   :  { %110 = vsyncpa [#allocation4], 1 }

</bundles_post_ra>
